<compile_context>
chip_gen: v7x
topology: tpu7x:2x2x1
jax: 0.10.0
libtpu: 0.0.40
codegen_flags: <defaults>
</compile_context>

<pallas_src>
import functools

import jax
import jax.numpy as jnp
from jax import lax
from jax.experimental import pallas as pl
from jax.experimental.pallas import tpu as pltpu


_LANE = 128
_SPLIT_MIN_BYTES = 4 * 1024 * 1024     # engage the 2-way K split only above this
_DEFAULT_VMEM_CAP = 64 * 1024 * 1024   # conservative fallback (v7x per-core VMEM)


def _cdiv(a, b):
    return -(-a // b)


def _round_up(x, m):
    return _cdiv(x, m) * m


def _vmem_budget_and_limit():
    """Generation-aware VMEM sizing: ~70% of physical for tiles, limit just above."""
    cap = _DEFAULT_VMEM_CAP
    try:
        info = pltpu.get_tpu_info()
        c = int(getattr(info, "vmem_capacity_bytes", 0) or 0)
        if c > 0:
            cap = c
    except Exception:
        pass  # query unavailable -> keep the conservative (v7x-safe) default
    budget = int(cap * 0.70)                          # v7x ~45 MiB, v5e/v6e ~90 MiB
    limit = min(budget + (8 << 20), int(cap * 0.85))  # v7x ~53 MiB, v6e ~98 MiB
    return budget, limit


def _plan(M, K, dtype_bytes, tk, num_splits):
    """Choose K tile size, number of K splits, tiles per split."""
    budget, vmem_limit = _vmem_budget_and_limit()
    # Resident VMEM besides the streamed feature tile: f32 (M, M) accumulator
    # scratch + double-buffered (M, M) f32 output block + compiler scratch margin.
    fixed = 3 * M * M * 4 + (1 << 20)
    avail = budget - fixed
    if avail < 2 * M * _LANE * dtype_bytes:
        # TODO(synk): tile M (Gram row/col blocks) for very large B*C instead of failing.
        raise ValueError(
            f"B*C = {M} is too large for a VMEM-resident (M, M) Gram accumulator "
            f"(VMEM budget {budget} bytes)")

    K128 = _round_up(K, _LANE)
    total_bytes = M * K * dtype_bytes
    if num_splits is None:
        num_splits = 2 if (total_bytes >= _SPLIT_MIN_BYTES and K128 >= 2 * _LANE) else 1

    if tk is None:
        # As big as the VMEM budget allows (double-buffered feature tile), but
        # never more than one split's worth of columns; multiple of 128.
        tk_vmem = max(_LANE, (avail // (2 * M * dtype_bytes)) // _LANE * _LANE)
        tk_need = _round_up(_cdiv(K128, num_splits), _LANE)
        tk = min(tk_vmem, tk_need)
        if tk >= K:
            tk = K   # single full-width block (legal even when K % 128 != 0)
    else:
        tk = min(int(tk), K)
        if tk != K and tk % _LANE != 0:
            raise ValueError(f"tk={tk} must be a multiple of {_LANE} or equal K={K}")

    n_tiles = _cdiv(K, tk)
    num_splits = min(num_splits, n_tiles)
    kpc = _cdiv(n_tiles, num_splits)     # K tiles handled per split
    return tk, num_splits, kpc, n_tiles, vmem_limit


def _gram_partial_kernel(f_ref, out_ref, acc_ref, *, tk, k_valid, n_tiles,
                         ragged, need_guard):
    c = pl.program_id(0)            # split index ("parallel": v7x core split)
    k = pl.program_id(1)            # local K-tile index within the split
    kpc = pl.num_programs(1)
    g = c * kpc + k                 # global K-tile index

    @pl.when(k == 0)
    def _():
        acc_ref[...] = jnp.zeros_like(acc_ref)

    def accumulate():
        f = f_ref[...]              # (M, tk), native dtype
        if ragged:
            # Zero the lanes past the true K on the ragged tail tile
            # (other tiles: mask is all-true, a cheap VPU no-op).
            col = g * tk + lax.broadcasted_iota(jnp.int32, f_ref.shape, 1)
            f = jnp.where(col < k_valid, f, jnp.zeros_like(f))
        # F @ F.T: contract the last dim of both operands (no explicit
        # transpose), f32 accumulation on the MXU.
        acc_ref[...] += lax.dot_general(
            f, f,
            dimension_numbers=(((1,), (1,)), ((), ())),
            preferred_element_type=jnp.float32,
        )

    if need_guard:
        # Grid overhang: tiles with g >= n_tiles are duplicates (their
        # index_map is clamped to a valid tile); skip their contribution.
        @pl.when(g < n_tiles)
        def _():
            accumulate()
    else:
        accumulate()

    @pl.when(k == kpc - 1)
    def _():
        out_ref[...] = acc_ref[...]


def _gram_partials(feats, tk, num_splits, kpc, n_tiles, vmem_limit):
    """Pallas call returning (num_splits, M, M) f32 partial F @ F.T sums."""
    M, K = feats.shape
    dtype_bytes = jnp.dtype(feats.dtype).itemsize
    ragged = (K % tk) != 0
    need_guard = (num_splits * kpc) != n_tiles

    if need_guard:
        def f_index(c, k):
            return (0, jnp.minimum(c * kpc + k, n_tiles - 1))
    else:
        def f_index(c, k):
            return (0, c * kpc + k)

    kernel = functools.partial(
        _gram_partial_kernel, tk=tk, k_valid=K, n_tiles=n_tiles,
        ragged=ragged, need_guard=need_guard)

    cost = pl.CostEstimate(
        flops=2 * M * M * K,
        transcendentals=0,
        bytes_accessed=M * K * dtype_bytes + num_splits * M * M * 4,
    )

    return pl.pallas_call(
        kernel,
        out_shape=jax.ShapeDtypeStruct((num_splits, M, M), jnp.float32),
        grid_spec=pltpu.PrefetchScalarGridSpec(
            num_scalar_prefetch=0,
            grid=(num_splits, kpc),
            in_specs=[pl.BlockSpec((M, tk), f_index)],          # features (streamed)
            out_specs=pl.BlockSpec((None, M, M), lambda c, k: (c, 0, 0)),
            scratch_shapes=[pltpu.VMEM((M, M), jnp.float32)],    # resident accumulator
        ),
        compiler_params=pltpu.CompilerParams(
            dimension_semantics=("parallel", "arbitrary"),
            vmem_limit_bytes=vmem_limit,
        ),
        cost_estimate=cost,
    )(feats)


def _gram_unnormalized(data, *, tk=None, num_splits=None):
    if data.ndim != 4:
        raise ValueError(f"expected NCHW input, got shape {data.shape}")
    B, C, H, W = data.shape
    M, K = B * C, H * W
    feats = data.reshape(M, K)           # free reshape; no padding pass over HBM
    dtype_bytes = jnp.dtype(data.dtype).itemsize
    tk, num_splits, kpc, n_tiles, vmem_limit = _plan(M, K, dtype_bytes, tk, num_splits)
    partials = _gram_partials(feats, tk, num_splits, kpc, n_tiles, vmem_limit)
    return partials.sum(axis=0)          # (M, M) f32, un-normalized F @ F.T


def gram_matrix(data, *, tk=None, num_splits=None):
    """Gram matrix of an NCHW tensor: (B*C, B*C) float32, divided by B*C*H*W."""
    B, C, H, W = data.shape
    n = float(B * C * H * W)
    return _gram_unnormalized(data, tk=tk, num_splits=num_splits) * (1.0 / n)


def style_loss_forward(data, target_gram, *, tk=None, num_splits=None):
    """forward(data) of StyleLoss: scalar MSE between Gram(data) and target."""
    B, C, H, W = data.shape
    M = B * C
    n = float(B * C * H * W)
    assert target_gram.shape == (M, M)
    g = _gram_unnormalized(data, tk=tk, num_splits=num_splits) * (1.0 / n)
    d = g - target_gram.astype(jnp.float32)
    return jnp.mean(d * d)


# ----------------------------------------------------------------------------
# Thin module-like wrapper mirroring the PyTorch class.
# ----------------------------------------------------------------------------
class StyleLoss:
    def __init__(self, target_feature):
        # "detach": plain array, no grads involved.
        self.target = gram_matrix(target_feature)

    def __call__(self, data):
        return style_loss_forward(data, self.target)


if __name__ == "__main__":
    key = jax.random.PRNGKey(0)
    k_tgt, k_in, k_t2a, k_t2b = jax.random.split(key, 4)

    def ref_gram(d):
        B, C, H, W = d.shape
        f = d.reshape(B * C, H * W).astype(jnp.float32)
        g = jnp.matmul(f, f.T, precision=jax.lax.Precision.HIGHEST)
        return g / (B * C * H * W)

    # --- Main demo path: B=2, C=4, H=W=16 (M=8, K=256 -> single grid step). ---
    target_feature = jax.random.normal(k_tgt, (2, 4, 16, 16), dtype=jnp.float32)
    x = jax.random.normal(k_in, (2, 4, 16, 16), dtype=jnp.float32)

    module = StyleLoss(target_feature)
    loss = jax.block_until_ready(module(x))

    ref = jnp.mean((ref_gram(x) - ref_gram(target_feature)) ** 2)
    assert jnp.allclose(loss, ref, rtol=1e-5, atol=1e-6), (loss, ref)

    # --- Exercise ragged-K masking + 2-way split + overhang guard with a forced
    #     small tile: B=2, C=8, H=W=18 (M=16, K=324; tk=128 -> 3 tiles, 2 splits). ---
    tf2 = jax.random.normal(k_t2a, (2, 8, 18, 18), dtype=jnp.float32)
    x2 = jax.random.normal(k_t2b, (2, 8, 18, 18), dtype=jnp.float32)
    tgt2 = gram_matrix(tf2, tk=128, num_splits=2)
    loss2 = jax.block_until_ready(
        style_loss_forward(x2, tgt2, tk=128, num_splits=2))
    ref2 = jnp.mean((ref_gram(x2) - ref_gram(tf2)) ** 2)
    assert jnp.allclose(loss2, ref2, rtol=1e-5, atol=1e-6), (loss2, ref2)

    print("KERNEL_OK")
</pallas_src>

<mosaic_0001>
module attributes {stable_mosaic.version = 11 : i64} {
  func.func @_gram_partial_kernel(%arg0: i32, %arg1: i32, %arg2: memref<8x256xf32, #tpu.memory_space<vmem>>, %arg3: memref<1x8x8xf32, #tpu.memory_space<vmem>>, %arg4: memref<8x8xf32, #tpu.memory_space<vmem>>) attributes {dimension_semantics = [#tpu.dimension_semantics<parallel>, #tpu.dimension_semantics<arbitrary>], iteration_bounds = array<i64: 1, 1>, scalar_prefetch = 0 : i64, scratch_operands = 1 : i64, tpu.core_type = #tpu.core_type<tc>, window_params = [{transform_indices = @transform_0, window_bounds = array<i64: 8, 256>}, {transform_indices = @transform_1, window_bounds = array<i64: 1, 8, 8>}]} {
    %c0_i32 = arith.constant 0 : i32
    %0 = arith.cmpi eq, %arg1, %c0_i32 : i32
    %1 = arith.extui %0 : i1 to i32
    %c0_i32_0 = arith.constant 0 : i32
    %2 = arith.cmpi ne, %1, %c0_i32_0 : i32
    scf.if %2 {
      %cst_8 = arith.constant 0.000000e+00 : f32
      %11 = vector.broadcast %cst_8 : f32 to vector<8x8xf32>
      %c0_9 = arith.constant 0 : index
      %c0_10 = arith.constant 0 : index
      %12 = vector.load %arg4[%c0_9, %c0_10] : memref<8x8xf32, #tpu.memory_space<vmem>>, vector<8x8xf32>
      tpu.vector_store %arg4[%c0_9, %c0_10], %11 {strides = array<i32>} : memref<8x8xf32, #tpu.memory_space<vmem>>, vector<8x8xf32>,
    } else {
    }
    %c0 = arith.constant 0 : index
    %c0_1 = arith.constant 0 : index
    %3 = vector.load %arg2[%c0, %c0_1] : memref<8x256xf32, #tpu.memory_space<vmem>>, vector<8x256xf32>
    %c0_2 = arith.constant 0 : index
    %c0_3 = arith.constant 0 : index
    %4 = vector.load %arg4[%c0_2, %c0_3] : memref<8x8xf32, #tpu.memory_space<vmem>>, vector<8x8xf32>
    %cst = arith.constant dense<0.000000e+00> : vector<8x8xf32>
    %5 = tpu.matmul %3, %3, %cst {dimension_numbers = #tpu.dot_dimension_numbers<[1], [1], [0], [0], [0, 0, 1, 0], [], []>} : vector<8x256xf32>, vector<8x256xf32>, vector<8x8xf32> -> vector<8x8xf32>
    %6 = arith.addf %4, %5 : vector<8x8xf32>
    %c0_4 = arith.constant 0 : index
    %c0_5 = arith.constant 0 : index
    %7 = vector.load %arg4[%c0_4, %c0_5] : memref<8x8xf32, #tpu.memory_space<vmem>>, vector<8x8xf32>
    tpu.vector_store %arg4[%c0_4, %c0_5], %6 {strides = array<i32>} : memref<8x8xf32, #tpu.memory_space<vmem>>, vector<8x8xf32>,
    %c0_i32_6 = arith.constant 0 : i32
    %8 = arith.cmpi eq, %arg1, %c0_i32_6 : i32
    %9 = arith.extui %8 : i1 to i32
    %c0_i32_7 = arith.constant 0 : i32
    %10 = arith.cmpi ne, %9, %c0_i32_7 : i32
    scf.if %10 {
      %c0_8 = arith.constant 0 : index
      %c0_9 = arith.constant 0 : index
      %11 = vector.load %arg4[%c0_8, %c0_9] : memref<8x8xf32, #tpu.memory_space<vmem>>, vector<8x8xf32>
      %c0_10 = arith.constant 0 : index
      %c0_11 = arith.constant 0 : index
      %c0_12 = arith.constant 0 : index
      %12 = vector.load %arg3[%c0_10, %c0_11, %c0_12] : memref<1x8x8xf32, #tpu.memory_space<vmem>>, vector<1x8x8xf32>
      %13 = vector.shape_cast %12 : vector<1x8x8xf32> to vector<8x8xf32>
      %14 = vector.shape_cast %11 : vector<8x8xf32> to vector<1x8x8xf32>
      tpu.vector_store %arg3[%c0_10, %c0_11, %c0_12], %14 {strides = array<i32>} : memref<1x8x8xf32, #tpu.memory_space<vmem>>, vector<1x8x8xf32>,
    } else {
    }
    return
  }
  func.func @transform_0(%arg0: i32, %arg1: i32) -> (i32, i32) {
    %c1_i32 = arith.constant 1 : i32
    %0 = arith.muli %arg0, %c1_i32 : i32
    %1 = arith.addi %0, %arg1 : i32
    %c0_i32 = arith.constant 0 : i32
    %c0_i32_0 = arith.constant 0 : i32
    return %c0_i32, %1 : i32, i32
  }
  func.func @transform_1(%arg0: i32, %arg1: i32) -> (i32, i32, i32) {
    %c0_i32 = arith.constant 0 : i32
    %c0_i32_0 = arith.constant 0 : i32
    %c0_i32_1 = arith.constant 0 : i32
    return %arg0, %c0_i32, %c0_i32_0 : i32, i32, i32
  }
}

</mosaic_0001>

<bundles_post_ra>
// kernel: tpu_custom_call.1
= control target key start
LH: loop header
LB: loop body
LE: loop exit
PB: predicated region body
PF: predicated region fallthrough
CT: control target
= control target key end

     0   :  { %6 = vsyncpa [#allocation4], 0  ;;  %s220_s0 = inlined_call_operand.hbm [shape: f32[8,256], index: 0, kind: input, shape index: {}]   ;;  %s221_s1 = inlined_call_operand.hbm [shape: f32[1,8,8], index: 1, kind: output, shape index: {}]  }
   0x1   :  { %7 = vsyncpa [#allocation5], 0  ;;  %s180_s6 = smov [#allocation3]   ;;  %s132_s10 = scalar_lea.hbm %s220_s0, 256 }
   0x2   :  { %s18_s7 = sshll.u32 %s180_s6, 4  ;;  %p133_p0 = scmp.ne.s32.totalorder %s220_s0, %s132_s10  ;;  %s19_s7 = int_to_ptr.vmem [resolvable:$true] %s18_s7 }
   0x3   :  { %p136_p1 = scmp.lt.u32.totalorder %s132_s10, %s220_s0 }
   0x5   :  { %p138_p2 = pnand %p136_p1, %p133_p0 }
   0x7   :  { %141 = shalt.err (!%p138_p2)
}
   0x8   :  { %s142_s15 = scalar_lea.vmem %s19_s7, 256  ;;  %p147_p4 = scmp.lt.s32.totalorder %s19_s7, %s19_s7 }
   0x9   :  { %p143_p3 = scmp.ne.s32.totalorder %s19_s7, %s142_s15  ;;  %p148_p5 = scmp.lt.s32.totalorder %s142_s15, %s142_s15 }
   0xb   :  { %p149_p6 = por %p148_p5, %p147_p4 }
   0xd   :  { %p150_p7 = pnand %p149_p6, %p143_p3 }
   0xf   :  { %153 = shalt.err (!%p150_p7)
}
  0x10   :  { %21 = dma.hbm_to_vmem [thread:$0]  %s220_s0, 256, %s19_s7, [#allocation4]  }
  0x11   :  { %176 = dma.done.wait [#allocation4], 256  }
  0x12   :  { %177 = vsyncadd [#allocation4], 4294967040  ;;  %vm31_vm0 = vcmask 64512   ;;  %v181_v0 = vmov 0.0   ;;  %v34_v1 = vld [vmem:[#allocation3 + $0x8] sm:$0xff]  ;;  %v33_v2 = vld [vmem:[#allocation3] sm:$0xff] }
  0x13   :  { %32 = vst.msk [vmem:[#allocation2] sm:$0xff] %vm31_vm0, %v181_v0  ;;  %36 = vmatprep.subr.mxu0 %v34_v1  ;;  %100 = vmatprep.mubr.f32.mxu0 %v34_v1  ;;  %s182_s18 = smov [#allocation6]  }
  0x14   :  { %37 = vmatpush1.xpose.msra.mxu0 %v33_v2  ;;  %s120_s0 = sshll.u32 %s182_s18, 4  ;;  %s121_s0 = int_to_ptr.vmem [resolvable:$true] %s120_s0 }
  0x15   :  { %s154_s19 = scalar_lea.vmem %s121_s0, 128  ;;  %p159_p9 = scmp.lt.s32.totalorder %s121_s0, %s121_s0 }
  0x16   :  { %p155_p8 = scmp.ne.s32.totalorder %s121_s0, %s154_s19  ;;  %p160_p10 = scmp.lt.s32.totalorder %s154_s19, %s154_s19 }
  0x17   :  { %101 = vmatmul.mubr.f32.vlgmr.msra.gmra.mrb[0].mxu0 %v33_v2 }
  0x18   :  { %p161_p11 = por %p160_p10, %p159_p9 }
  0x1a   :  { %v35_v3 = vld [vmem:[#allocation2] sm:$0xff]  ;;  %p162_p12 = pnand %p161_p11, %p155_p8 }
  0xea   :  { %v102_v4 = vpop.f32.mrb[0].mxu0 }
  0xeb   :  { %v106_v5 = vadd.f32 %v102_v4, %v35_v3  ;;  %v104_v6 = vpop.f32.mrb[1].mxu0 }
  0xed   :  { %108 = vst.msk [vmem:[#allocation2] sm:$0xff] %vm31_vm0, %v106_v5 }
  0xf4   :  { %v112_v7 = vld [vmem:[#allocation2] sm:$0xff] }
  0xf5   :  { %113 = vst.msk [vmem:[#allocation6] sm:$0xff] %vm31_vm0, %v112_v7 }
  0xf6   :  { %165 = shalt.err (!%p162_p12)
}
  0xf7   :  { %s166_s22 = scalar_lea.hbm %s221_s1, 128 }
  0xf8   :  { %p167_p13 = scmp.ne.s32.totalorder %s221_s1, %s166_s22  ;;  %p170_p0 = scmp.lt.u32.totalorder %s166_s22, %s221_s1 }
  0xfa   :  { %p172_p1 = pnand %p170_p0, %p167_p13 }
  0xfc   :  { %175 = shalt.err (!%p172_p1)
}
  0xfd   :  { %123 = dma.vmem_to_hbm [thread:$0]  %s121_s0, 128, %s221_s1, [#allocation5]  }
  0xfe   :  { %178 = dma.done.wait [#allocation5], 128  }
  0xff   :  { %179 = vsyncadd [#allocation5], 4294967168 }
 0x100   :  { %127 = vsyncpa [#allocation4], 1 }
 0x101   :  { %128 = vsyncpa [#allocation5], 1 }

</bundles_post_ra>
